<compile_context>
chip_gen: v7x
topology: tpu7x:2x2x1
jax: 0.10.0
libtpu: 0.0.40
codegen_flags: <defaults>
</compile_context>

<pallas_src>
import functools

import jax
import jax.numpy as jnp
from jax import lax
from jax.experimental import pallas as pl
from jax.experimental.pallas import tpu as pltpu


def _st_gumbel_gate_kernel(x_ref, w_ref, g_ref, o_ref, *, n_experts):
    """One batch tile: logits -> +gumbel -> first-argmax -> one-hot."""
    x = x_ref[...]                      # [TB, F]    (native dtype)
    w = w_ref[...]                      # [E_pad, F] (native dtype, resident)

    # expert_logits = F.linear(x, W) = x @ W.T  -> [TB, E_pad]  (MXU, f32 acc)
    logits = lax.dot_general(
        x, w, (((1,), (1,)), ((), ())), preferred_element_type=jnp.float32
    )

    # z = logits + gumbel.  softmax(z / T) is strictly monotone in z for T > 0,
    # so argmax(z) already determines the (one-hot) forward output.
    z = logits + g_ref[...]

    tb, e_pad = z.shape
    lane = lax.broadcasted_iota(jnp.int32, (tb, e_pad), 1)
    valid = lane < n_experts
    z = jnp.where(valid, z, -jnp.inf)   # mask padded expert lanes

    # First-argmax one-hot (matches torch.max first-index tie-break).
    z_max = jnp.max(z, axis=-1, keepdims=True)
    first_idx = jnp.min(
        jnp.where(z == z_max, lane, jnp.int32(e_pad)), axis=-1, keepdims=True
    )
    o_ref[...] = (lane == first_idx).astype(o_ref.dtype)


def st_gumbel_softmax_gate(x, gate_weights, key, temperature=1.0, block_b=512):
    """Forward of STGumbelSoftmax.

    x:            [B, in_features]
    gate_weights: [n_experts, in_features]  (as the PyTorch Parameter)
    key:          jax PRNG key for the Gumbel noise
    returns:      [B, n_experts] float32, each row a one-hot vector
    """
    del temperature  # argmax is invariant to the (positive) temperature scale
    B, F = x.shape
    E = gate_weights.shape[0]
    E_pad = 128 * pl.cdiv(E, 128)               # lane-dense expert axis

    # Batch tiling: large double-buffered tiles; last tile padded with 0-rows.
    TB = block_b if B > block_b else B          # block_b is a multiple of 8
    num_tiles = pl.cdiv(B, TB)
    B_pad = num_tiles * TB

    x_p = jnp.pad(x, ((0, B_pad - B), (0, 0)))
    w_p = jnp.pad(gate_weights, ((0, E_pad - E), (0, 0)))

    # Gumbel noise (same transform as sample_gumbel in the module).
    eps = jnp.float32(1e-20)
    u = jax.random.uniform(key, (B_pad, E_pad), dtype=jnp.float32)
    gumbel = -jnp.log(-jnp.log(u + eps) + eps)

    kernel = functools.partial(_st_gumbel_gate_kernel, n_experts=E)

    # VMEM budget: double-buffered x / gumbel / out tiles + resident weights.
    step_bytes = (
        TB * F * x_p.dtype.itemsize             # one x tile
        + TB * E_pad * 4                        # one gumbel tile
        + TB * E_pad * 4                        # one out tile
    )
    vmem_limit = 2 * step_bytes + E_pad * F * w_p.dtype.itemsize + (2 << 20)
    vmem_limit = int(min(max(vmem_limit, 16 << 20), 48 << 20))

    out = pl.pallas_call(
        kernel,
        out_shape=jax.ShapeDtypeStruct((B_pad, E_pad), jnp.float32),
        grid=(num_tiles,),
        in_specs=[
            pl.BlockSpec((TB, F), lambda i: (i, 0)),       # x tiles (streamed)
            pl.BlockSpec((E_pad, F), lambda i: (0, 0)),    # weights (resident)
            pl.BlockSpec((TB, E_pad), lambda i: (i, 0)),   # gumbel tiles
        ],
        out_specs=pl.BlockSpec((TB, E_pad), lambda i: (i, 0)),
        compiler_params=pltpu.CompilerParams(
            dimension_semantics=("parallel",),
            vmem_limit_bytes=vmem_limit,
        ),
    )(x_p, w_p, gumbel)

    return out[:B, :E]


if __name__ == "__main__":
    # Small shapes consistent with the module's forward: x is [batch, in_features].
    batch, in_features, n_experts = 8, 32, 8
    temperature = 1.0

    root = jax.random.PRNGKey(0)
    k_x, k_noise = jax.random.split(root)
    x = jax.random.normal(k_x, (batch, in_features), dtype=jnp.float32)

    # Module __init__: gate_weights is (n_experts, in_features), reset to 0.0.
    gate_weights = jnp.zeros((n_experts, in_features), dtype=jnp.float32)

    out = st_gumbel_softmax_gate(x, gate_weights, k_noise, temperature=temperature)
    out = jax.block_until_ready(out)

    # Sanity: output is [batch, n_experts], each row an exact one-hot vector.
    assert out.shape == (batch, n_experts)
    assert bool(jnp.all(jnp.abs(jnp.sum(out, axis=-1) - 1.0) < 1e-6))
    assert bool(jnp.all((out == 0.0) | (out == 1.0)))

    print("KERNEL_OK")
</pallas_src>

<mosaic_0001>
module attributes {stable_mosaic.version = 11 : i64} {
  func.func @_st_gumbel_gate_kernel(%arg0: i32, %arg1: memref<8x32xf32, #tpu.memory_space<vmem>>, %arg2: memref<128x32xf32, #tpu.memory_space<vmem>>, %arg3: memref<8x128xf32, #tpu.memory_space<vmem>>, %arg4: memref<8x128xf32, #tpu.memory_space<vmem>>) attributes {dimension_semantics = [#tpu.dimension_semantics<parallel>], iteration_bounds = array<i64: 1>, scalar_prefetch = 0 : i64, scratch_operands = 0 : i64, tpu.core_type = #tpu.core_type<tc>, window_params = [{transform_indices = @transform_0, window_bounds = array<i64: 8, 32>}, {pipeline_mode = #tpu.pipeline_mode<synchronous>, transform_indices = @transform_1, window_bounds = array<i64: 128, 32>}, {transform_indices = @transform_2, window_bounds = array<i64: 8, 128>}, {transform_indices = @transform_3, window_bounds = array<i64: 8, 128>}]} {
    %c0 = arith.constant 0 : index
    %c0_0 = arith.constant 0 : index
    %0 = vector.load %arg1[%c0, %c0_0] : memref<8x32xf32, #tpu.memory_space<vmem>>, vector<8x32xf32>
    %c0_1 = arith.constant 0 : index
    %c0_2 = arith.constant 0 : index
    %1 = vector.load %arg2[%c0_1, %c0_2] : memref<128x32xf32, #tpu.memory_space<vmem>>, vector<128x32xf32>
    %cst = arith.constant dense<0.000000e+00> : vector<8x128xf32>
    %2 = tpu.matmul %0, %1, %cst {dimension_numbers = #tpu.dot_dimension_numbers<[1], [1], [0], [0], [0, 0, 1, 0], [], []>} : vector<8x32xf32>, vector<128x32xf32>, vector<8x128xf32> -> vector<8x128xf32>
    %c0_3 = arith.constant 0 : index
    %c0_4 = arith.constant 0 : index
    %3 = vector.load %arg3[%c0_3, %c0_4] : memref<8x128xf32, #tpu.memory_space<vmem>>, vector<8x128xf32>
    %4 = arith.addf %2, %3 : vector<8x128xf32>
    %5 = tpu.iota {dimensions = array<i32: 1>} : vector<8x128xi32>
    %c8_i32 = arith.constant 8 : i32
    %6 = vector.broadcast %c8_i32 : i32 to vector<8x128xi32>
    %7 = arith.cmpi slt, %5, %6 : vector<8x128xi32>
    %cst_5 = arith.constant 0xFF800000 : f32
    %8 = vector.broadcast %cst_5 : f32 to vector<8x128xf32>
    %9 = arith.select %7, %4, %8 : vector<8x128xi1>, vector<8x128xf32>
    %cst_6 = arith.constant dense<0xFF800000> : vector<8xf32>
    %10 = vector.multi_reduction <maximumf>, %9, %cst_6 [1] : vector<8x128xf32> to vector<8xf32>
    %11 = vector.shape_cast %10 : vector<8xf32> to vector<8x1xf32>
    %12 = vector.broadcast %11 : vector<8x1xf32> to vector<8x128xf32>
    %13 = arith.cmpf oeq, %9, %12 : vector<8x128xf32>
    %c128_i32 = arith.constant 128 : i32
    %14 = vector.broadcast %c128_i32 : i32 to vector<8x128xi32>
    %15 = arith.select %13, %5, %14 : vector<8x128xi1>, vector<8x128xi32>
    %cst_7 = arith.constant dense<2147483647> : vector<8xi32>
    %16 = vector.multi_reduction <minsi>, %15, %cst_7 [1] : vector<8x128xi32> to vector<8xi32>
    %17 = vector.shape_cast %16 : vector<8xi32> to vector<8x1xi32>
    %18 = vector.broadcast %17 : vector<8x1xi32> to vector<8x128xi32>
    %19 = arith.cmpi eq, %5, %18 : vector<8x128xi32>
    %20 = arith.extui %19 : vector<8x128xi1> to vector<8x128xi32>
    %21 = arith.sitofp %20 : vector<8x128xi32> to vector<8x128xf32>
    %c0_8 = arith.constant 0 : index
    %c0_9 = arith.constant 0 : index
    %22 = vector.load %arg4[%c0_8, %c0_9] : memref<8x128xf32, #tpu.memory_space<vmem>>, vector<8x128xf32>
    tpu.vector_store %arg4[%c0_8, %c0_9], %21 {strides = array<i32>} : memref<8x128xf32, #tpu.memory_space<vmem>>, vector<8x128xf32>,
    return
  }
  func.func @transform_0(%arg0: i32) -> (i32, i32) {
    %c0_i32 = arith.constant 0 : i32
    %c0_i32_0 = arith.constant 0 : i32
    return %arg0, %c0_i32 : i32, i32
  }
  func.func @transform_1(%arg0: i32) -> (i32, i32) {
    %c0_i32 = arith.constant 0 : i32
    %c0_i32_0 = arith.constant 0 : i32
    %c0_i32_1 = arith.constant 0 : i32
    return %c0_i32, %c0_i32_0 : i32, i32
  }
  func.func @transform_2(%arg0: i32) -> (i32, i32) {
    %c0_i32 = arith.constant 0 : i32
    %c0_i32_0 = arith.constant 0 : i32
    return %arg0, %c0_i32 : i32, i32
  }
  func.func @transform_3(%arg0: i32) -> (i32, i32) {
    %c0_i32 = arith.constant 0 : i32
    %c0_i32_0 = arith.constant 0 : i32
    return %arg0, %c0_i32 : i32, i32
  }
}

</mosaic_0001>

<bundles_post_ra>
// kernel: tpu_custom_call.1
= control target key start
LH: loop header
LB: loop body
LE: loop exit
PB: predicated region body
PF: predicated region fallthrough
CT: control target
= control target key end

     0   :  { %vm33_vm0 = vcmask 261120   ;;  %v325_v2 = vmov 0.0|0.0   ;;  %vm326_vm2 = vmmov 0   ;;  %v327_v5 = vmov 0.0   ;;  %s440_s0 = inlined_call_operand.vmem [shape: f32[8,32], index: 0, kind: input, shape index: {}]   ;;  %s441_s1 = inlined_call_operand.vmem [shape: f32[128,32], index: 1, kind: input, shape index: {}]   ;;  %s442_s2 = inlined_call_operand.vmem [shape: f32[8,128], index: 2, kind: input, shape index: {}]   ;;  %s443_s3 = inlined_call_operand.hbm [shape: f32[8,128], index: 3, kind: output, shape index: {}]  }
   0x1   :  { %v16_v0 = vld [vmem:[%s441_s1] sm:$0xff]  ;;  %v17_v1 = vld [vmem:[%s441_s1 + $0x8] sm:$0xff]  ;;  %265 = vmatprep.subr.bf16.mxu0 %v325_v2  ;;  %vm357_vm1 = vmpackc.low %vm33_vm0, %vm33_vm0  ;;  %262 = vmatprep.mubr.msk.f32.mxu0 %vm326_vm2, %v327_v5 }
   0x2   :  { %v266_v3 = vpack.c.bf16 %v17_v1, %v16_v0  ;;  %v18_v6 = vld [vmem:[%s441_s1 + $0x10] sm:$0xff]  ;;  %v19_v7 = vld [vmem:[%s441_s1 + $0x18] sm:$0xff] }
   0x4   :  { %268 = vmatpush3.bf16.xpose.msk.msra.mxu0 %vm357_vm1, %v266_v3 }
   0x5   :  { %269 = vmatprep.subr.bf16.mxu0 %v325_v2 }
   0x6   :  { %8 = vsyncpa [#allocation3], 0  ;;  %v270_v8 = vpack.c.bf16 %v19_v7, %v18_v6  ;;  %v20_v9 = vld [vmem:[%s441_s1 + $0x20] sm:$0xff]  ;;  %v21_v10 = vld [vmem:[%s441_s1 + $0x28] sm:$0xff]  ;;  %v155_v28 = vlaneseq }
   0x7   :  { %v274_v11 = vpack.c.bf16 %v21_v10, %v20_v9  ;;  %v22_v12 = vld [vmem:[%s441_s1 + $0x30] sm:$0xff]  ;;  %v23_v13 = vld [vmem:[%s441_s1 + $0x38] sm:$0xff]  ;;  %v24_v15 = vld [vmem:[%s441_s1 + $0x40] sm:$0xff] }
   0x8   :  { %v278_v14 = vpack.c.bf16 %v23_v13, %v22_v12  ;;  %v25_v16 = vld [vmem:[%s441_s1 + $0x48] sm:$0xff]  ;;  %v26_v18 = vld [vmem:[%s441_s1 + $0x50] sm:$0xff]  ;;  %v27_v19 = vld [vmem:[%s441_s1 + $0x58] sm:$0xff]  ;;  %v156_v29 = vand.u32 127, %v155_v28 }
   0x9   :  { %v282_v17 = vpack.c.bf16 %v25_v16, %v24_v15  ;;  %v286_v20 = vpack.c.bf16 %v27_v19, %v26_v18  ;;  %v28_v21 = vld [vmem:[%s441_s1 + $0x60] sm:$0xff]  ;;  %v29_v22 = vld [vmem:[%s441_s1 + $0x68] sm:$0xff]  ;;  %v30_v24 = vld [vmem:[%s441_s1 + $0x70] sm:$0xff] }
   0xa   :  { %v290_v23 = vpack.c.bf16 %v29_v22, %v28_v21  ;;  %v31_v25 = vld [vmem:[%s441_s1 + $0x78] sm:$0xff]  ;;  %v15_v27 = vld [vmem:[%s440_s0] sm:$0xff]  ;;  %vm157_vm3 = vcmp.lt.s32.totalorder %v156_v29, 8  ;;  %s328_s0 = smov [#allocation2]  }
   0xb   :  { %v294_v26 = vpack.c.bf16 %v31_v25, %v30_v24  ;;  %v32_v30 = vld [vmem:[%s442_s2] sm:$0xff]  ;;  %s187_s1 = sshll.u32 %s328_s0, 4  ;;  %s188_s1 = int_to_ptr.vmem [resolvable:$true] %s187_s1 }
   0xc   :  { %272 = vmatpush3.bf16.xpose.msk.msra.mxu0 %vm357_vm1, %v270_v8  ;;  %s301_s2 = scalar_lea.vmem %s188_s1, 128  ;;  %p306_p1 = scmp.lt.s32.totalorder %s188_s1, %s188_s1 }
   0xd   :  { %273 = vmatprep.subr.bf16.mxu0 %v325_v2  ;;  %p302_p0 = scmp.ne.s32.totalorder %s188_s1, %s301_s2  ;;  %p307_p2 = scmp.lt.s32.totalorder %s301_s2, %s301_s2 }
   0xf   :  { %p308_p3 = por %p307_p2, %p306_p1 }
  0x11   :  { %p309_p4 = pnand %p308_p3, %p302_p0 }
  0x14   :  { %276 = vmatpush3.bf16.xpose.msk.msra.mxu0 %vm357_vm1, %v274_v11 }
  0x15   :  { %277 = vmatprep.subr.bf16.mxu0 %v325_v2 }
  0x1c   :  { %280 = vmatpush3.bf16.xpose.msk.msra.mxu0 %vm357_vm1, %v278_v14 }
  0x1d   :  { %281 = vmatprep.subr.bf16.mxu0 %v325_v2 }
  0x24   :  { %284 = vmatpush3.bf16.xpose.msk.msra.mxu0 %vm357_vm1, %v282_v17 }
  0x25   :  { %285 = vmatprep.subr.bf16.mxu0 %v325_v2 }
  0x2c   :  { %288 = vmatpush3.bf16.xpose.msk.msra.mxu0 %vm357_vm1, %v286_v20 }
  0x2d   :  { %289 = vmatprep.subr.bf16.mxu0 %v325_v2 }
  0x34   :  { %292 = vmatpush3.bf16.xpose.msk.msra.mxu0 %vm357_vm1, %v290_v23 }
  0x35   :  { %293 = vmatprep.subr.bf16.mxu0 %v325_v2 }
  0x3c   :  { %296 = vmatpush3.bf16.xpose.msk.msra.mxu0 %vm357_vm1, %v294_v26 }
  0x43   :  { %263 = vmatmul.mubr.msk.f32.vlgmr.msra.gmra.mrb[0].mxu0 %vm33_vm0, %v15_v27 }
 0x116   :  { %v151_v31 = vpop.f32.mrb[0].mxu0 }
 0x117   :  { %v152_v32 = vadd.f32 %v151_v31, %v32_v30  ;;  %v264_v33 = vpop.f32.mrb[1].mxu0 }
 0x119   :  { %v158_v34 = vsel %vm157_vm3, %v152_v32, -inf }
 0x11a   :  { %159 = vmax.xlane.f32.xlu0 %v158_v34 }
 0x1a7   :  { %v160_v35 = vpop.xlane.xlu0 %159 }
 0x1a8   :  { %vm161_vm4 = vcmp.eq.f32.partialorder %v158_v34, %v160_v35 }
 0x1a9   :  { %v162_v36 = vsel %vm161_vm4, %v156_v29, 128 }
 0x1aa   :  { %v164_v37 = vshra.s32 %v162_v36, 16  ;;  %v163_v39 = vand.u32 65535, %v162_v36 }
 0x1ac   :  { %v166_v38 = vcvt.s32.f32 %v164_v37  ;;  %v165_v41 = vcvt.s32.f32 %v163_v39 }
 0x1ae   :  { %167 = vmin.xlane.f32.xlu0 %v166_v38 }
 0x23b   :  { %v168_v40 = vpop.xlane.xlu0 %167 }
 0x23c   :  { %vm169_vm5 = vcmp.eq.f32.partialorder %v166_v38, %v168_v40  ;;  %v174_v43 = vcvt.f32.s32 %v168_v40 }
 0x23d   :  { %v170_v42 = vsel %vm169_vm5, %v165_v41, inf }
 0x23e   :  { %171 = vmin.xlane.f32.xlu1 %v170_v42  ;;  %v175_v45 = vshll.u32 %v174_v43, 16 }
 0x2cb   :  { %v172_v44 = vpop.xlane.xlu1 %171 }
 0x2cc   :  { %v173_v46 = vcvt.f32.s32 %v172_v44 }
 0x2ce   :  { %v176_v47 = vadd.s32 %v175_v45, %v173_v46 }
 0x2d0   :  { %vm177_vm6 = vcmp.eq.s32.totalorder %v156_v29, %v176_v47 }
 0x2d1   :  { %v212_v48 = vsel %vm177_vm6, 1.0, %v327_v5 }
 0x2d2   :  { %180 = vst [vmem:[#allocation2] sm:$0xff] %v212_v48 }
 0x2d3   :  { %312 = shalt.err (!%p309_p4)
}
 0x2d4   :  { %s313_s23 = scalar_lea.hbm %s443_s3, 128 }
 0x2d5   :  { %p314_p5 = scmp.ne.s32.totalorder %s443_s3, %s313_s23  ;;  %p317_p6 = scmp.lt.u32.totalorder %s313_s23, %s443_s3 }
 0x2d7   :  { %p319_p7 = pnand %p317_p6, %p314_p5 }
 0x2d9   :  { %322 = shalt.err (!%p319_p7)
}
 0x2da   :  { %190 = dma.vmem_to_hbm [thread:$0]  %s188_s1, 128, %s443_s3, [#allocation3]  }
 0x2db   :  { %323 = dma.done.wait [#allocation3], 128  }
 0x2dc   :  { %324 = vsyncadd [#allocation3], 4294967168 }
 0x2dd   :  { %194 = vsyncpa [#allocation3], 1 }

</bundles_post_ra>
